<compile_context>
chip_gen: v6e
topology: v6e:2x2x1
jax: 0.10.0
libtpu: 0.0.40
codegen_flags: <defaults>
</compile_context>

<pallas_src>
import functools

import jax
import jax.numpy as jnp
from jax.experimental import pallas as pl
from jax.experimental.pallas import tpu as pltpu


def _round_up(x: int, m: int) -> int:
    return (x + m - 1) // m * m


def _apply_activation(h, name: str):
    # TODO(synk): activation_cls is configurable in the PyTorch module; only common
    # choices are mapped here.
    if name == "silu":
        return jax.nn.silu(h)
    if name == "relu":
        return jnp.maximum(h, 0.0)
    if name == "gelu":
        return jax.nn.gelu(h)
    if name == "identity":
        return h
    raise ValueError(f"unsupported activation: {name}")


def _graph_scalar_head_kernel(
    x_ref,       # (TILE_N, D)   bf16 node features ("energy")
    w1_ref,      # (D, D)        bf16 hidden Linear weight (in, out)
    b1_ref,      # (1, D)        f32
    w2r_ref,     # (1, D)        f32 final Linear weight stored as a row (w2^T)
    b2_ref,      # (1, 1)        f32
    batch_ref,   # (1, TILE_N)   int32 node -> graph id (padded rows hold n_graphs)
    scale_ref,   # (1, 1)        f32
    shift_ref,   # (1, 1)        f32
    out_ref,     # (G, 1)        f32 per-graph scalar (resident accumulator block)
    pooled_acc,  # (G, D)        f32 scratch: sum_{n in g} h_n
    cnt_acc,     # (G, 1)        f32 scratch: nodes per graph
    *,
    n_graphs: int,
    reduction: str,
    activation: str,
):
    i = pl.program_id(0)

    @pl.when(i == 0)
    def _init():
        pooled_acc[...] = jnp.zeros_like(pooled_acc)
        cnt_acc[...] = jnp.zeros_like(cnt_acc)

    # ---- hidden layer: (TILE_N, D) @ (D, D) on the MXU, bf16 in / f32 accumulate ----
    h = jnp.dot(x_ref[...], w1_ref[...], preferred_element_type=jnp.float32)
    h = _apply_activation(h + b1_ref[...], activation)                     # f32

    # ---- segment pooling on the MXU: one-hot (G, TILE_N) @ h (TILE_N, D) ----
    tile_n = x_ref.shape[0]
    ids = batch_ref[...]                                                   # (1, TILE_N)
    g_iota = jax.lax.broadcasted_iota(jnp.int32, (n_graphs, tile_n), 0)    # (G, TILE_N)
    onehot = jnp.where(ids == g_iota, 1.0, 0.0)                            # f32 (G, TILE_N)
    pooled_acc[...] += jnp.dot(
        onehot.astype(jnp.bfloat16),
        h.astype(jnp.bfloat16),
        preferred_element_type=jnp.float32,
    )                                                                      # (G, D)
    cnt_acc[...] += jnp.sum(onehot, axis=1, keepdims=True)                 # (G, 1)

    # ---- finalize on the last tile: project to scalar, fold b2/scale/shift/reduction ----
    @pl.when(i == pl.num_programs(0) - 1)
    def _finalize():
        pooled = pooled_acc[...]                                           # (G, D)
        cnt = cnt_acc[...]                                                 # (G, 1)
        z = jnp.sum(pooled * w2r_ref[...], axis=1, keepdims=True)          # (G, 1)
        b2 = b2_ref[...]
        scale = scale_ref[...]
        shift = shift_ref[...]
        if reduction == "mean":
            res = (z / jnp.maximum(cnt, 1.0) + b2) * scale + shift
            out_ref[...] = jnp.where(cnt > 0.0, res, 0.0)
        else:  # "sum"
            out_ref[...] = z * scale + cnt * (b2 * scale + shift)


def graph_scalar_output_head(
    energy,            # (N, D) node features from the backbone
    batch,             # (N,)   int node -> graph index
    w1, b1, w2, b2,    # MLP params: Linear(D, D) -> activation -> Linear(D, 1)
    *,
    n_graphs: int,
    scale=None,
    shift=None,
    reduction: str = "sum",
    activation: str = "silu",
    tile_n: int = 1024,
):
    # TODO(synk): num_mlps is fixed at 2 here (Linear(D,D) -> act -> Linear(D,1));
    # the PyTorch MLP([d_model]*num_mlps + [1]) supports other depths.
    N, D = energy.shape

    # Node tile: multiple of 128 so the (1, TILE_N) batch-id row and the (TILE_N, D)
    # activation block satisfy (8, 128) layout rules, and small enough that a
    # double-buffered bf16 tile stays well inside v7x's 64 MiB VMEM.
    tile_n = max(128, (int(tile_n) // 128) * 128)
    tile_n = min(tile_n, _round_up(N, 128))
    n_pad = _round_up(N, tile_n)
    num_tiles = n_pad // tile_n
    pad = n_pad - N

    x = energy.astype(jnp.bfloat16)
    ids = batch.astype(jnp.int32)
    if pad:
        x = jnp.pad(x, ((0, pad), (0, 0)))
        # Padded rows get an out-of-range graph id so they never hit the one-hot.
        ids = jnp.pad(ids, (0, pad), constant_values=n_graphs)
    ids = ids.reshape(1, n_pad)

    w1_b = w1.astype(jnp.bfloat16)                              # (D, D) in->out
    b1_r = b1.reshape(1, D).astype(jnp.float32)
    w2_row = jnp.reshape(w2, (1, D)).astype(jnp.float32)        # (D,1) / (D,) -> row
    b2_s = jnp.asarray(b2, jnp.float32).reshape(1, 1)
    scale_s = jnp.full((1, 1), 1.0 if scale is None else scale, jnp.float32)
    shift_s = jnp.full((1, 1), 0.0 if shift is None else shift, jnp.float32)

    kernel = functools.partial(
        _graph_scalar_head_kernel,
        n_graphs=n_graphs,
        reduction=reduction,
        activation=activation,
    )

    grid_spec = pltpu.PrefetchScalarGridSpec(
        num_scalar_prefetch=0,
        grid=(num_tiles,),
        in_specs=[
            pl.BlockSpec((tile_n, D), lambda i: (i, 0)),   # x: streams over node tiles
            pl.BlockSpec((D, D), lambda i: (0, 0)),        # w1: VMEM-resident
            pl.BlockSpec((1, D), lambda i: (0, 0)),        # b1
            pl.BlockSpec((1, D), lambda i: (0, 0)),        # w2 row
            pl.BlockSpec((1, 1), lambda i: (0, 0)),        # b2
            pl.BlockSpec((1, tile_n), lambda i: (0, i)),   # batch ids: streams
            pl.BlockSpec((1, 1), lambda i: (0, 0)),        # scale
            pl.BlockSpec((1, 1), lambda i: (0, 0)),        # shift
        ],
        out_specs=pl.BlockSpec((n_graphs, 1), lambda i: (0, 0)),   # resident accumulator
        scratch_shapes=[
            pltpu.VMEM((n_graphs, D), jnp.float32),
            pltpu.VMEM((n_graphs, 1), jnp.float32),
        ],
    )

    # VMEM budget: double-buffered streamed blocks + resident weights + accumulators.
    vmem_est = (
        2 * (tile_n * D * 2 + tile_n * 4)        # x (bf16) + batch ids (int32), 2 buffers each
        + D * D * 2 + 2 * D * 4 + 3 * 4          # w1 (bf16), b1 + w2 row (f32), scalar params
        + n_graphs * (D + 2) * 4                 # pooled/cnt scratch + output block
    )
    vmem_limit = int(min(64 << 20, max(2 * vmem_est, 8 << 20)))

    cost = pl.CostEstimate(
        flops=2 * n_pad * D * (D + n_graphs) + 2 * n_graphs * D,
        transcendentals=n_pad * D,               # exp inside SiLU
        bytes_accessed=x.size * 2 + ids.size * 4 + w1_b.size * 2
        + (2 * D + 3) * 4 + n_graphs * 4,
    )

    out = pl.pallas_call(
        kernel,
        out_shape=jax.ShapeDtypeStruct((n_graphs, 1), jnp.float32),
        grid_spec=grid_spec,
        compiler_params=pltpu.CompilerParams(
            # Single reduction axis into a resident accumulator.
            # TODO(synk): on v7x, add a leading 'parallel' axis of size 2 with two partial
            # (G, 1) accumulators summed in the wrapper to use both TensorCores.
            dimension_semantics=("arbitrary",),
            vmem_limit_bytes=vmem_limit,
        ),
        cost_estimate=cost,
    )(x, w1_b, b1_r, w2_row, b2_s, ids, scale_s, shift_s)

    # rearrange 'b 1 -> b'
    return out.reshape(n_graphs)


def _reference(energy, batch, w1, b1, w2, b2, *, n_graphs, scale, shift, reduction,
               activation="silu"):
    h = _apply_activation(energy @ w1 + b1, activation)
    o = h @ jnp.reshape(w2, (-1, 1)) + jnp.asarray(b2).reshape(1, 1)
    if scale is not None:
        o = o * scale
    if shift is not None:
        o = o + shift
    seg = jax.ops.segment_sum(o, batch, num_segments=n_graphs)
    if reduction == "mean":
        cnt = jax.ops.segment_sum(
            jnp.ones((energy.shape[0], 1), jnp.float32), batch, num_segments=n_graphs)
        seg = seg / jnp.maximum(cnt, 1.0)
    return seg.reshape(n_graphs)


if __name__ == "__main__":
    key = jax.random.PRNGKey(0)
    k_x, k_b, k_w1, k_b1, k_w2, k_b2 = jax.random.split(key, 6)

    # Small shapes: 300 nodes, d_model=32, 3 graphs; tile_n=128 -> 3 node tiles
    # (with 84 padded rows) so the grid / accumulator / padding paths are exercised.
    N, D, G = 300, 32, 3
    energy = jax.random.normal(k_x, (N, D), dtype=jnp.float32)
    batch = jax.random.randint(k_b, (N,), 0, G, dtype=jnp.int32)

    # Deterministic synthetic MLP parameters: Linear(D, D), activation, Linear(D, 1)
    w1 = jax.random.normal(k_w1, (D, D), dtype=jnp.float32) * 0.1
    b1 = jax.random.normal(k_b1, (D,), dtype=jnp.float32) * 0.1
    w2 = jax.random.normal(k_w2, (D, 1), dtype=jnp.float32) * 0.1
    b2 = jax.random.normal(k_b2, (1,), dtype=jnp.float32) * 0.1

    scale, shift = 2.0, 0.5

    for reduction in ("sum", "mean"):
        out = graph_scalar_output_head(
            energy, batch, w1, b1, w2, b2,
            n_graphs=G, scale=scale, shift=shift,
            reduction=reduction, activation="silu", tile_n=128,
        )
        out = jax.block_until_ready(out)
        ref = _reference(
            energy, batch, w1, b1, w2, b2,
            n_graphs=G, scale=scale, shift=shift, reduction=reduction,
        )
        assert out.shape == (G,)
        # bf16 MXU operands -> relaxed tolerance vs. the f32 reference
        assert jnp.allclose(out, ref, rtol=2e-2, atol=1e-1), (reduction, out, ref)

    print("KERNEL_OK")
</pallas_src>

<mosaic_0001>
module attributes {stable_mosaic.version = 11 : i64} {
  func.func @_graph_scalar_head_kernel(%arg0: i32, %arg1: memref<128x32xbf16, #tpu.memory_space<vmem>>, %arg2: memref<32x32xbf16, #tpu.memory_space<vmem>>, %arg3: memref<1x32xf32, #tpu.memory_space<vmem>>, %arg4: memref<1x32xf32, #tpu.memory_space<vmem>>, %arg5: memref<1x1xf32, #tpu.memory_space<vmem>>, %arg6: memref<1x128xi32, #tpu.memory_space<vmem>>, %arg7: memref<1x1xf32, #tpu.memory_space<vmem>>, %arg8: memref<1x1xf32, #tpu.memory_space<vmem>>, %arg9: memref<3x1xf32, #tpu.memory_space<vmem>>, %arg10: memref<3x32xf32, #tpu.memory_space<vmem>>, %arg11: memref<3x1xf32, #tpu.memory_space<vmem>>) attributes {dimension_semantics = [#tpu.dimension_semantics<arbitrary>], iteration_bounds = array<i64: 3>, scalar_prefetch = 0 : i64, scratch_operands = 2 : i64, tpu.core_type = #tpu.core_type<tc>, window_params = [{transform_indices = @transform_0, window_bounds = array<i64: 128, 32>}, {pipeline_mode = #tpu.pipeline_mode<synchronous>, transform_indices = @transform_1, window_bounds = array<i64: 32, 32>}, {pipeline_mode = #tpu.pipeline_mode<synchronous>, transform_indices = @transform_2, window_bounds = array<i64: 1, 32>}, {pipeline_mode = #tpu.pipeline_mode<synchronous>, transform_indices = @transform_3, window_bounds = array<i64: 1, 32>}, {pipeline_mode = #tpu.pipeline_mode<synchronous>, transform_indices = @transform_4, window_bounds = array<i64: 1, 1>}, {transform_indices = @transform_5, window_bounds = array<i64: 1, 128>}, {pipeline_mode = #tpu.pipeline_mode<synchronous>, transform_indices = @transform_6, window_bounds = array<i64: 1, 1>}, {pipeline_mode = #tpu.pipeline_mode<synchronous>, transform_indices = @transform_7, window_bounds = array<i64: 1, 1>}, {pipeline_mode = #tpu.pipeline_mode<synchronous>, transform_indices = @transform_8, window_bounds = array<i64: 3, 1>}]} {
    %c0_i32 = arith.constant 0 : i32
    %0 = arith.cmpi eq, %arg0, %c0_i32 : i32
    %1 = arith.extui %0 : i1 to i32
    %c0_i32_0 = arith.constant 0 : i32
    %2 = arith.cmpi ne, %1, %c0_i32_0 : i32
    scf.if %2 {
      %cst_22 = arith.constant 0.000000e+00 : f32
      %36 = vector.broadcast %cst_22 : f32 to vector<3x32xf32>
      %c0_23 = arith.constant 0 : index
      %c0_24 = arith.constant 0 : index
      %37 = vector.load %arg10[%c0_23, %c0_24] : memref<3x32xf32, #tpu.memory_space<vmem>>, vector<3x32xf32>
      tpu.vector_store %arg10[%c0_23, %c0_24], %36 {strides = array<i32>} : memref<3x32xf32, #tpu.memory_space<vmem>>, vector<3x32xf32>,
      %cst_25 = arith.constant 0.000000e+00 : f32
      %38 = vector.broadcast %cst_25 : f32 to vector<3x1xf32>
      %c0_26 = arith.constant 0 : index
      %c0_27 = arith.constant 0 : index
      %39 = vector.load %arg11[%c0_26, %c0_27] : memref<3x1xf32, #tpu.memory_space<vmem>>, vector<3x1xf32>
      tpu.vector_store %arg11[%c0_26, %c0_27], %38 {strides = array<i32>} : memref<3x1xf32, #tpu.memory_space<vmem>>, vector<3x1xf32>,
    } else {
    }
    %c0 = arith.constant 0 : index
    %c0_1 = arith.constant 0 : index
    %3 = vector.load %arg1[%c0, %c0_1] : memref<128x32xbf16, #tpu.memory_space<vmem>>, vector<128x32xbf16>
    %c0_2 = arith.constant 0 : index
    %c0_3 = arith.constant 0 : index
    %4 = vector.load %arg2[%c0_2, %c0_3] : memref<32x32xbf16, #tpu.memory_space<vmem>>, vector<32x32xbf16>
    %cst = arith.constant dense<0.000000e+00> : vector<128x32xf32>
    %5 = tpu.matmul %3, %4, %cst {dimension_numbers = #tpu.dot_dimension_numbers<[1], [0], [0], [1], [0, 0, 1, 1], [], []>} : vector<128x32xbf16>, vector<32x32xbf16>, vector<128x32xf32> -> vector<128x32xf32>
    %c0_4 = arith.constant 0 : index
    %c0_5 = arith.constant 0 : index
    %6 = vector.load %arg3[%c0_4, %c0_5] : memref<1x32xf32, #tpu.memory_space<vmem>>, vector<1x32xf32>
    %7 = vector.broadcast %6 : vector<1x32xf32> to vector<128x32xf32>
    %8 = arith.addf %5, %7 : vector<128x32xf32>
    %9 = arith.negf %8 : vector<128x32xf32>
    %10 = math.exp %9 : vector<128x32xf32>
    %cst_6 = arith.constant 1.000000e+00 : f32
    %11 = vector.broadcast %cst_6 : f32 to vector<128x32xf32>
    %12 = arith.addf %11, %10 : vector<128x32xf32>
    %13 = arith.divf %11, %12 : vector<128x32xf32>
    %14 = arith.mulf %8, %13 : vector<128x32xf32>
    %c0_7 = arith.constant 0 : index
    %c0_8 = arith.constant 0 : index
    %15 = vector.load %arg6[%c0_7, %c0_8] : memref<1x128xi32, #tpu.memory_space<vmem>>, vector<1x128xi32>
    %16 = tpu.iota {dimensions = array<i32: 0>} : vector<3x128xi32>
    %17 = vector.broadcast %15 : vector<1x128xi32> to vector<3x128xi32>
    %18 = arith.cmpi eq, %17, %16 : vector<3x128xi32>
    %cst_9 = arith.constant 1.000000e+00 : f32
    %cst_10 = arith.constant 0.000000e+00 : f32
    %19 = vector.broadcast %cst_9 : f32 to vector<3x128xf32>
    %20 = vector.broadcast %cst_10 : f32 to vector<3x128xf32>
    %21 = arith.select %18, %19, %20 : vector<3x128xi1>, vector<3x128xf32>
    %c0_11 = arith.constant 0 : index
    %c0_12 = arith.constant 0 : index
    %22 = vector.load %arg10[%c0_11, %c0_12] : memref<3x32xf32, #tpu.memory_space<vmem>>, vector<3x32xf32>
    %23 = arith.truncf %21 : vector<3x128xf32> to vector<3x128xbf16>
    %24 = arith.truncf %14 : vector<128x32xf32> to vector<128x32xbf16>
    %cst_13 = arith.constant dense<0.000000e+00> : vector<3x32xf32>
    %25 = tpu.matmul %23, %24, %cst_13 {dimension_numbers = #tpu.dot_dimension_numbers<[1], [0], [0], [1], [0, 0, 1, 1], [], []>} : vector<3x128xbf16>, vector<128x32xbf16>, vector<3x32xf32> -> vector<3x32xf32>
    %26 = arith.addf %22, %25 : vector<3x32xf32>
    %c0_14 = arith.constant 0 : index
    %c0_15 = arith.constant 0 : index
    %27 = vector.load %arg10[%c0_14, %c0_15] : memref<3x32xf32, #tpu.memory_space<vmem>>, vector<3x32xf32>
    tpu.vector_store %arg10[%c0_14, %c0_15], %26 {strides = array<i32>} : memref<3x32xf32, #tpu.memory_space<vmem>>, vector<3x32xf32>,
    %c0_16 = arith.constant 0 : index
    %c0_17 = arith.constant 0 : index
    %28 = vector.load %arg11[%c0_16, %c0_17] : memref<3x1xf32, #tpu.memory_space<vmem>>, vector<3x1xf32>
    %cst_18 = arith.constant dense<0.000000e+00> : vector<3xf32>
    %29 = vector.multi_reduction <add>, %21, %cst_18 [1] : vector<3x128xf32> to vector<3xf32>
    %30 = vector.shape_cast %29 : vector<3xf32> to vector<3x1xf32>
    %31 = arith.addf %28, %30 : vector<3x1xf32>
    %c0_19 = arith.constant 0 : index
    %c0_20 = arith.constant 0 : index
    %32 = vector.load %arg11[%c0_19, %c0_20] : memref<3x1xf32, #tpu.memory_space<vmem>>, vector<3x1xf32>
    tpu.vector_store %arg11[%c0_19, %c0_20], %31 {strides = array<i32>} : memref<3x1xf32, #tpu.memory_space<vmem>>, vector<3x1xf32>,
    %c2_i32 = arith.constant 2 : i32
    %33 = arith.cmpi eq, %arg0, %c2_i32 : i32
    %34 = arith.extui %33 : i1 to i32
    %c0_i32_21 = arith.constant 0 : i32
    %35 = arith.cmpi ne, %34, %c0_i32_21 : i32
    scf.if %35 {
      %c0_22 = arith.constant 0 : index
      %c0_23 = arith.constant 0 : index
      %36 = vector.load %arg10[%c0_22, %c0_23] : memref<3x32xf32, #tpu.memory_space<vmem>>, vector<3x32xf32>
      %c0_24 = arith.constant 0 : index
      %c0_25 = arith.constant 0 : index
      %37 = vector.load %arg11[%c0_24, %c0_25] : memref<3x1xf32, #tpu.memory_space<vmem>>, vector<3x1xf32>
      %c0_26 = arith.constant 0 : index
      %c0_27 = arith.constant 0 : index
      %38 = vector.load %arg4[%c0_26, %c0_27] : memref<1x32xf32, #tpu.memory_space<vmem>>, vector<1x32xf32>
      %39 = vector.broadcast %38 : vector<1x32xf32> to vector<3x32xf32>
      %40 = arith.mulf %36, %39 : vector<3x32xf32>
      %cst_28 = arith.constant dense<0.000000e+00> : vector<3xf32>
      %41 = vector.multi_reduction <add>, %40, %cst_28 [1] : vector<3x32xf32> to vector<3xf32>
      %42 = vector.shape_cast %41 : vector<3xf32> to vector<3x1xf32>
      %c0_29 = arith.constant 0 : index
      %c0_30 = arith.constant 0 : index
      %43 = vector.load %arg5[%c0_29, %c0_30] : memref<1x1xf32, #tpu.memory_space<vmem>>, vector<1x1xf32>
      %c0_31 = arith.constant 0 : index
      %c0_32 = arith.constant 0 : index
      %44 = vector.load %arg7[%c0_31, %c0_32] : memref<1x1xf32, #tpu.memory_space<vmem>>, vector<1x1xf32>
      %c0_33 = arith.constant 0 : index
      %c0_34 = arith.constant 0 : index
      %45 = vector.load %arg8[%c0_33, %c0_34] : memref<1x1xf32, #tpu.memory_space<vmem>>, vector<1x1xf32>
      %46 = vector.broadcast %44 : vector<1x1xf32> to vector<3x1xf32>
      %47 = arith.mulf %42, %46 : vector<3x1xf32>
      %48 = arith.mulf %43, %44 : vector<1x1xf32>
      %49 = arith.addf %48, %45 : vector<1x1xf32>
      %50 = vector.broadcast %49 : vector<1x1xf32> to vector<3x1xf32>
      %51 = arith.mulf %37, %50 : vector<3x1xf32>
      %52 = arith.addf %47, %51 : vector<3x1xf32>
      %c0_35 = arith.constant 0 : index
      %c0_36 = arith.constant 0 : index
      %53 = vector.load %arg9[%c0_35, %c0_36] : memref<3x1xf32, #tpu.memory_space<vmem>>, vector<3x1xf32>
      tpu.vector_store %arg9[%c0_35, %c0_36], %52 {strides = array<i32>} : memref<3x1xf32, #tpu.memory_space<vmem>>, vector<3x1xf32>,
    } else {
    }
    return
  }
  func.func @transform_0(%arg0: i32) -> (i32, i32) {
    %c0_i32 = arith.constant 0 : i32
    %c0_i32_0 = arith.constant 0 : i32
    return %arg0, %c0_i32 : i32, i32
  }
  func.func @transform_1(%arg0: i32) -> (i32, i32) {
    %c0_i32 = arith.constant 0 : i32
    %c0_i32_0 = arith.constant 0 : i32
    %c0_i32_1 = arith.constant 0 : i32
    return %c0_i32, %c0_i32_0 : i32, i32
  }
  func.func @transform_2(%arg0: i32) -> (i32, i32) {
    %c0_i32 = arith.constant 0 : i32
    %c0_i32_0 = arith.constant 0 : i32
    %c0_i32_1 = arith.constant 0 : i32
    return %c0_i32, %c0_i32_0 : i32, i32
  }
  func.func @transform_3(%arg0: i32) -> (i32, i32) {
    %c0_i32 = arith.constant 0 : i32
    %c0_i32_0 = arith.constant 0 : i32
    %c0_i32_1 = arith.constant 0 : i32
    return %c0_i32, %c0_i32_0 : i32, i32
  }
  func.func @transform_4(%arg0: i32) -> (i32, i32) {
    %c0_i32 = arith.constant 0 : i32
    %c0_i32_0 = arith.constant 0 : i32
    %c0_i32_1 = arith.constant 0 : i32
    return %c0_i32, %c0_i32_0 : i32, i32
  }
  func.func @transform_5(%arg0: i32) -> (i32, i32) {
    %c0_i32 = arith.constant 0 : i32
    %c0_i32_0 = arith.constant 0 : i32
    return %c0_i32, %arg0 : i32, i32
  }
  func.func @transform_6(%arg0: i32) -> (i32, i32) {
    %c0_i32 = arith.constant 0 : i32
    %c0_i32_0 = arith.constant 0 : i32
    %c0_i32_1 = arith.constant 0 : i32
    return %c0_i32, %c0_i32_0 : i32, i32
  }
  func.func @transform_7(%arg0: i32) -> (i32, i32) {
    %c0_i32 = arith.constant 0 : i32
    %c0_i32_0 = arith.constant 0 : i32
    %c0_i32_1 = arith.constant 0 : i32
    return %c0_i32, %c0_i32_0 : i32, i32
  }
  func.func @transform_8(%arg0: i32) -> (i32, i32) {
    %c0_i32 = arith.constant 0 : i32
    %c0_i32_0 = arith.constant 0 : i32
    %c0_i32_1 = arith.constant 0 : i32
    return %c0_i32, %c0_i32_0 : i32, i32
  }
}

</mosaic_0001>

<bundles_post_ra>
// kernel: tpu_custom_call.1
= control target key start
LH: loop header
LB: loop body
LE: loop exit
PB: predicated region body
PF: predicated region fallthrough
CT: control target
= control target key end

     0   :  { %s1040_s11 = smov 0   ;;  %s1185_s0 = inlined_call_operand.vmem [shape: bf16[384,32], index: 0, kind: input, shape index: {}]   ;;  %s1186_s1 = inlined_call_operand.vmem [shape: bf16[32,32], index: 1, kind: input, shape index: {}]   ;;  %s1187_s2 = inlined_call_operand.vmem [shape: f32[1,32], index: 2, kind: input, shape index: {}]   ;;  %s1188_s3 = inlined_call_operand.vmem [shape: f32[1,32], index: 3, kind: input, shape index: {}]   ;;  %s1189_s4 = inlined_call_operand.<no memory space> [shape: f32[1,1], index: 4, kind: input, shape index: {}]   ;;  %s1190_s5 = inlined_call_operand.vmem [shape: s32[1,384], index: 5, kind: input, shape index: {}]   ;;  %s1191_s8 = inlined_call_operand.vmem [shape: f32[3,1], index: 8, kind: output, shape index: {}]   ;;  %s1192_s6 = inlined_call_operand.<no memory space> [shape: f32[1,1], index: 6, kind: input, shape index: {}]   ;;  %s1193_s7 = inlined_call_operand.<no memory space> [shape: f32[1,1], index: 7, kind: input, shape index: {}]  }
   0x1   :  { %v13_v0 = vstv %s1189_s4  ;;  %v15_v1 = vstv %s1192_s6  ;;  %v17_v2 = vstv %s1193_s7 }
   0x2   :  { %14 = vst [vmem:[#allocation4] sm:$0x1] %v13_v0  ;;  %16 = vst [vmem:[#allocation5] sm:$0x1] %v15_v1 }
   0x3   :  { %18 = vst [vmem:[#allocation6] sm:$0x1] %v17_v2 }
   0x4 LB: > { %s1046_s4 = sadd.s32 4294967295, %s980_s11   ;;  %p783_p0 = scmp.ge.s32.totalorder %s980_s11, 1  ;;  %s980_s11 = sphi %s1040_s11, %s24_s11  }
   0x5   : > { %p272_p1 = scmp.lt.s32.totalorder %s980_s11, 4 }
   0x7   : > { %p273_p2 = pnand %p783_p0, %p272_p1 }
   0x8   : > { %s784_s6 = sshll.u32 (!%p273_p2), %s1046_s4, 4  ;;  %p310_p3 = scmp.lt.s32.totalorder (!%p273_p2), %s1046_s4, 2 }
   0x9   : > { %276 = sbr.rel (%p273_p2) target bundleno = 671 (0x29f), region = 52  ;;  %p305_p4 = scmp.lt.s32.totalorder (!%p273_p2), %s784_s6, 47 }
   0xa   : > { %p786_p5 = scmp.ne.s32.totalorder (!%p273_p2), %s1046_s4, 0 }
   0xe   : > { %s1053_s7 = scalar_select %p310_p3, %s1046_s4, 2 }
   0xf   : > { %s1195_s6 = smov (!%p305_p4, %s784_s6), 47  ;;  %317 = sbr.rel (%p786_p5) target bundleno = 23 (0x17), region = 56 }
  0x10   : > { %s312_s14 = scalar_lea.vmem %s1190_s5, %s1053_s7  ;;  %s785_s15 = sshll.u32 %s1195_s6, 2 }
  0x11   : > { %s308_s18 = scalar_lea.vmem %s1185_s0, %s785_s15 }
  0x14   : > { %vm318_vm0 = vcmask 256000   ;;  %vm320_vm1 = vcmask 2048   ;;  %v982_v3 = vmov 0.0  }
  0x15   : > { %319 = vst.msk [vmem:[#allocation2] sm:$0x7] %vm318_vm0, %v982_v3 }
  0x16   : > { %321 = vst.msk [vmem:[#allocation3] sm:$0x7] %vm320_vm1, %v982_v3 }
  0x17 PF: > { %v900_v4 = vld [vmem:[%s1186_s1 + $0x8] sm:$0xff]   ;;  %v901_v5 = vld [vmem:[%s1186_s1] sm:$0xff]   ;;  %vm401_vm2 = vcmask 261120   ;;  %v904_v8 = vld [vmem:[%s308_s18 + $0x10] sm:$0xff]   ;;  %v983_v14 = vmov 0.0   ;;  %v636_v15 = vlaneseq  ;;  %vm984_vm3 = vmmov 0  }
  0x18   : > { %848 = vmatprep.subr.bf16.mxu0 %v900_v4  ;;  %v902_v6 = vld [vmem:[%s308_s18] sm:$0xff]   ;;  %v903_v7 = vld [vmem:[%s308_s18 + $0x8] sm:$0xff]   ;;  %v905_v9 = vld [vmem:[%s308_s18 + $0x18] sm:$0xff]   ;;  %868 = vmatprep.subr.bf16.mxu1 %v983_v14  ;;  %vm698_vm5 = vcmask 1042432   ;;  %vm703_vm7 = vcmask 2048   ;;  %vm695_vm8 = vcmask 256000  }
  0x19   : > { %849 = vmatpush3.bf16.msra.mxu0 %v900_v4  ;;  %852 = vmatprep.mubr.msk.bf16.mxu0 %vm401_vm2, %v902_v6  ;;  %v906_v10 = vld [vmem:[%s308_s18 + $0x20] sm:$0xff]   ;;  %v907_v11 = vld [vmem:[%s308_s18 + $0x28] sm:$0xff]   ;;  %v908_v12 = vld [vmem:[%s308_s18 + $0x30] sm:$0xff]   ;;  %v1078_v16 = vshrl.u32 %v636_v15, 7  ;;  %p825_p6 = scmp.ne.s32.totalorder %s1046_s4, 2 }
  0x1a   : > { %850 = vmatprep.subr.bf16.mxu0 %v901_v5  ;;  %v909_v13 = vld [vmem:[%s308_s18 + $0x38] sm:$0xff]   ;;  %v1085_v17 = vld [vmem:[%s312_s14] ss:$0 sm:$0xff]  ;;  %884 = vmatprep.mubr.msk.bf16.mxu1 %vm984_vm3, %v983_v14 }
  0x1b   : > { %vm642_vm4 = vcmp.eq.s32.totalorder %v1085_v17, %v1078_v16  ;;  %v787_v32 = vld [vmem:[%s1187_s2] ss:$0 sm:$0xff] }
  0x1c   : > { %v643_v18 = vsel %vm642_vm4, 1.0, %v983_v14  ;;  %vm823_vm6 = vmpackc.low %vm642_vm4, %vm642_vm4 }
  0x1d   : > { %851 = vmatpush3.bf16.msra.mxu0 %v901_v5  ;;  %v699_v19 = vsel %vm698_vm5, %v643_v18, 0.0 }
  0x1e   : > { %700 = vadd.xlane.f32.xlu0 %v699_v19 }
  0x20   : > { %853 = vmatmul.mubr.msk.bf16.vlgmr.msra.gmra.mxu0 %vm401_vm2, %v903_v7 }
  0x21   : > { %856 = vmatprep.mubr.msk.bf16.mxu0 %vm401_vm2, %v904_v8 }
  0x28   : > { %857 = vmatmul.mubr.msk.bf16.gmra.mxu0 %vm401_vm2, %v905_v9 }
  0x29   : > { %860 = vmatprep.mubr.msk.bf16.mxu0 %vm401_vm2, %v906_v10 }
  0x30   : > { %861 = vmatmul.mubr.msk.bf16.gmra.mxu0 %vm401_vm2, %v907_v11 }
  0x31   : > { %864 = vmatprep.mubr.msk.bf16.mxu0 %vm401_vm2, %v908_v12 }
  0x38   : > { %865 = vmatmul.mubr.msk.bf16.gmra.mxu0 %vm401_vm2, %v909_v13 }
  0xe0   : > { %v854_v20 = vpop.f32.mrf.mxu0 }
  0xe1   : > { %v1125_v55 = vadd.f32 %v854_v20, %v787_v32 }
  0xe2   : > { %v460_v21 = vpop.f32.mrf.mxu0 }
  0xe3   : > { %v808_v60 = vmul.f32 -1.442695, %v1125_v55  ;;  %v1141_v7 = vadd.f32 %v787_v32, %v460_v21 }
  0xe4   : > { %v855_v22 = vpop.f32.mrf.mxu0 }
  0xe5   : > { %v1134_v61 = vadd.f32 %v855_v22, %v787_v32  ;;  %v806_v19 = vmul.f32 -1.442695, %v1141_v7 }
  0xe6   : > { %v463_v23 = vpop.f32.mrf.mxu0 }
  0xe7   : > { %v809_v3 = vmul.f32 -1.442695, %v1134_v61  ;;  %v1139_v4 = vadd.f32 %v787_v32, %v463_v23 }
  0xe8   : > { %v858_v24 = vpop.f32.mrf.mxu0 }
  0xe9   : > { %v1122_v53 = vadd.f32 %v858_v24, %v787_v32  ;;  %v807_v12 = vmul.f32 -1.442695, %v1139_v4 }
  0xea   : > { %v476_v25 = vpop.f32.mrf.mxu0 }
  0xeb   : > { %v1130_v58 = vadd.f32 %v787_v32, %v476_v25  ;;  %v812_v59 = vmul.f32 -1.442695, %v1122_v53 }
  0xec   : > { %v859_v26 = vpop.f32.mrf.mxu0 }
  0xed   : > { %v1119_v51 = vadd.f32 %v859_v26, %v787_v32  ;;  %v810_v0 = vmul.f32 -1.442695, %v1130_v58 }
  0xee   : > { %v479_v27 = vpop.f32.mrf.mxu0 }
  0xef   : > { %v813_v56 = vmul.f32 -1.442695, %v1119_v51  ;;  %v1128_v57 = vadd.f32 %v787_v32, %v479_v27 }
  0xf0   : > { %v862_v28 = vpop.f32.mrf.mxu0 }
  0xf1   : > { %v1101_v37 = vadd.f32 %v862_v28, %v787_v32  ;;  %v811_v62 = vmul.f32 -1.442695, %v1128_v57 }
  0xf2   : > { %v492_v29 = vpop.f32.mrf.mxu0 }
  0xf3   : > { %v816_v46 = vmul.f32 -1.442695, %v1101_v37  ;;  %v1116_v49 = vadd.f32 %v787_v32, %v492_v29 }
  0xf4   : > { %v863_v30 = vpop.f32.mrf.mxu0 }
  0xf5   : > { %v1097_v34 = vadd.f32 %v863_v30, %v787_v32  ;;  %v814_v54 = vmul.f32 -1.442695, %v1116_v49 }
  0xf6   : > { %v495_v31 = vpop.f32.mrf.mxu0 }
  0xf7   : > { %v817_v41 = vmul.f32 -1.442695, %v1097_v34  ;;  %v1110_v44 = vadd.f32 %v787_v32, %v495_v31 }
  0xf8   : > { %v866_v33 = vpop.f32.mrf.mxu0 }
  0xf9   : > { %v1099_v35 = vadd.f32 %v866_v33, %v787_v32  ;;  %v815_v52 = vmul.f32 -1.442695, %v1110_v44 }
  0xfa   : > { %v508_v36 = vpop.f32.mrf.mxu0 }
  0xfb   : > { %v820_v38 = vmul.f32 -1.442695, %v1099_v35  ;;  %v1104_v39 = vadd.f32 %v787_v32, %v508_v36 }
  0xfc   : > { %v867_v40 = vpop.f32.mrf.mxu0 }
  0xfd   : > { %v818_v42 = vmul.f32 -1.442695, %v1104_v39  ;;  %v1108_v43 = vadd.f32 %v867_v40, %v787_v32  ;;  %910 = vpow2.f32 %v820_v38 }
  0xfe   : > { %v511_v45 = vpop.f32.mrf.mxu0 }
  0xff   : > { %v821_v47 = vmul.f32 -1.442695, %v1108_v43  ;;  %v1114_v48 = vadd.f32 %v787_v32, %v511_v45  ;;  %912 = vpow2.f32 %v818_v42 }
 0x100   : > { %914 = vpow2.f32 %v817_v41 }
 0x101   : > { %v819_v50 = vmul.f32 -1.442695, %v1114_v48  ;;  %916 = vpow2.f32 %v821_v47 }
 0x102   : > { %918 = vpow2.f32 %v816_v46 }
 0x103   : > { %920 = vpow2.f32 %v819_v50 }
 0x104   : > { %922 = vpow2.f32 %v815_v52 }
 0x105   : > { %924 = vpow2.f32 %v814_v54 }
 0x106   : > { %926 = vpow2.f32 %v813_v56 }
 0x107   : > { %928 = vpow2.f32 %v812_v59 }
 0x108   : > { %930 = vpow2.f32 %v808_v60 }
 0x109   : > { %932 = vpow2.f32 %v811_v62 }
 0x10a   : > { %v911_v63 = vpop.eup %910  ;;  %934 = vpow2.f32 %v810_v0 }
 0x10b   : > { %v585_v1 = vadd.f32 1.0, %v911_v63 }
 0x10c   : > { %v913_v2 = vpop.eup %912 }
 0x10d   : > { %v915_v5 = vpop.eup %914  ;;  %v583_v8 = vadd.f32 1.0, %v913_v2  ;;  %936 = vrcp.f32 %v585_v1 }
 0x10e   : > { %v917_v6 = vpop.eup %916  ;;  %938 = vpow2.f32 %v809_v3  ;;  %v582_v13 = vadd.f32 1.0, %v915_v5 }
 0x10f   : > { %v919_v9 = vpop.eup %918  ;;  %v586_v10 = vadd.f32 1.0, %v917_v6 }
 0x110   : > { %v921_v11 = vpop.eup %920  ;;  %v581_v20 = vadd.f32 1.0, %v919_v9 }
 0x111   : > { %940 = vrcp.f32 %v586_v10  ;;  %v584_v15 = vadd.f32 1.0, %v921_v11  ;;  %v923_v18 = vpop.eup %922 }
 0x112   : > { %942 = vrcp.f32 %v583_v8  ;;  %v925_v21 = vpop.eup %924  ;;  %v580_v22 = vadd.f32 1.0, %v923_v18 }
 0x113   : > { %944 = vrcp.f32 %v584_v15  ;;  %v927_v23 = vpop.eup %926  ;;  %v579_v24 = vadd.f32 1.0, %v925_v21 }
 0x114   : > { %946 = vpow2.f32 %v807_v12  ;;  %v929_v25 = vpop.eup %928  ;;  %v578_v27 = vadd.f32 1.0, %v927_v23  ;;  %v701_v23 = vpop.xlane.xlu0 %700 }
 0x115   : > { %948 = vrcp.f32 %v582_v13  ;;  %v931_v26 = vpop.eup %930  ;;  %v577_v30 = vadd.f32 1.0, %v929_v25 }
 0x116   : > { %950 = vpow2.f32 %v806_v19  ;;  %v933_v28 = vpop.eup %932  ;;  %v573_v59 = vadd.f32 1.0, %v931_v26 }
 0x117   : > { %952 = vrcp.f32 %v581_v20  ;;  %v935_v29 = vpop.eup %934  ;;  %v576_v33 = vadd.f32 1.0, %v933_v28 }
 0x118   : > { %954 = vrcp.f32 %v580_v22  ;;  %v575_v40 = vadd.f32 1.0, %v935_v29 }
 0x119   : > { %956 = vrcp.f32 %v579_v24 }
 0x11a   : > { %v937_v31 = vpop.eup %936  ;;  %958 = vrcp.f32 %v578_v27 }
 0x11b   : > { %v939_v32 = vpop.eup %938  ;;  %960 = vrcp.f32 %v577_v30  ;;  %v633_v41 = vmul.f32 %v937_v31, %v1099_v35 }
 0x11c   : > { %v574_v47 = vadd.f32 1.0, %v939_v32  ;;  %962 = vrcp.f32 %v576_v33 }
 0x11d   : > { %964 = vrcp.f32 %v575_v40 }
 0x11e   : > { %v941_v36 = vpop.eup %940  ;;  %966 = vrcp.f32 %v574_v47 }
 0x11f   : > { %v943_v38 = vpop.eup %942  ;;  %v634_v42 = vmul.f32 %v941_v36, %v1108_v43  ;;  %968 = vrcp.f32 %v573_v59 }
 0x120   : > { %v945_v45 = vpop.eup %944  ;;  %v631_v60 = vmul.f32 %v943_v38, %v1104_v39 }
 0x121   : > { %v947_v46 = vpop.eup %946  ;;  %v632_v50 = vmul.f32 %v945_v45, %v1114_v48  ;;  %v653_v52 = vpack.c.bf16 %v634_v42, %v633_v41 }
 0x122   : > { %v949_v54 = vpop.eup %948  ;;  %v572_v35 = vadd.f32 1.0, %v947_v46 }
 0x123   : > { %v951_v56 = vpop.eup %950  ;;  %869 = vmatpush3.bf16.msra.mxu1 %v653_v52  ;;  %v630_v43 = vmul.f32 %v949_v54, %v1097_v34  ;;  %v652_v63 = vpack.c.bf16 %v632_v50, %v631_v60 }
 0x124   : > { %v953_v62 = vpop.eup %952  ;;  %870 = vmatprep.subr.bf16.mxu1 %v983_v14  ;;  %v571_v1 = vadd.f32 1.0, %v951_v56  ;;  %970 = vrcp.f32 %v572_v35 }
 0x125   : > { %v955_v0 = vpop.eup %954  ;;  %v629_v48 = vmul.f32 %v953_v62, %v1101_v37 }
 0x126   : > { %v957_v2 = vpop.eup %956  ;;  %v628_v39 = vmul.f32 %v955_v0, %v1110_v44  ;;  %972 = vrcp.f32 %v571_v1 }
 0x127   : > { %871 = vmatpush3.bf16.msra.mxu1 %v652_v63  ;;  %v651_v3 = vpack.c.bf16 %v630_v43, %v629_v48  ;;  %v959_v5 = vpop.eup %958  ;;  %v627_v6 = vmul.f32 %v957_v2, %v1116_v49 }
 0x128   : > { %872 = vmatprep.subr.bf16.mxu1 %v983_v14  ;;  %v961_v34 = vpop.eup %960  ;;  %v626_v8 = vmul.f32 %v959_v5, %v1119_v51 }
 0x129   : > { %v650_v9 = vpack.c.bf16 %v628_v39, %v627_v6  ;;  %v963_v37 = vpop.eup %962  ;;  %v625_v10 = vmul.f32 %v961_v34, %v1122_v53 }
 0x12a   : > { %v965_v11 = vpop.eup %964  ;;  %v624_v44 = vmul.f32 %v963_v37, %v1128_v57 }
 0x12b   : > { %873 = vmatpush3.bf16.msra.mxu1 %v651_v3  ;;  %v649_v12 = vpack.c.bf16 %v626_v8, %v625_v10  ;;  %v967_v13 = vpop.eup %966  ;;  %v623_v49 = vmul.f32 %v965_v11, %v1130_v58 }
 0x12c   : > { %874 = vmatprep.subr.bf16.mxu1 %v983_v14  ;;  %v969_v15 = vpop.eup %968  ;;  %v622_v51 = vmul.f32 %v967_v13, %v1134_v61  ;;  %v697_v61 = vld [vmem:[#allocation3] sm:$0x7] }
 0x12d   : > { %v648_v18 = vpack.c.bf16 %v624_v44, %v623_v49  ;;  %v621_v53 = vmul.f32 %v969_v15, %v1125_v55  ;;  %v985_v55 = vmov 1.0|1.0   ;;  %v702_v24 = vadd.f32 %v701_v23, %v697_v61 }
 0x12f   : > { %875 = vmatpush3.bf16.msra.mxu1 %v650_v9  ;;  %v647_v21 = vpack.c.bf16 %v622_v51, %v621_v53  ;;  %704 = vst.msk [vmem:[#allocation3] sm:$0x7] %vm703_vm7, %v702_v24 }
 0x130   : > { %876 = vmatprep.subr.bf16.mxu1 %v983_v14 }
 0x131   : > { %v971_v19 = vpop.eup %970 }
 0x132   : > { %v620_v57 = vmul.f32 %v971_v19, %v1139_v4  ;;  %v644_v4 = vld [vmem:[#allocation2] sm:$0x7] }
 0x133   : > { %877 = vmatpush3.bf16.msra.mxu1 %v649_v12  ;;  %v973_v20 = vpop.eup %972 }
 0x134   : > { %878 = vmatprep.subr.bf16.mxu1 %v983_v14  ;;  %v619_v22 = vmul.f32 %v973_v20, %v1141_v7 }
 0x136   : > { %v646_v58 = vpack.c.bf16 %v620_v57, %v619_v22 }
 0x137   : > { %879 = vmatpush3.bf16.msra.mxu1 %v648_v18 }
 0x138   : > { %880 = vmatprep.subr.bf16.mxu1 %v983_v14 }
 0x13b   : > { %881 = vmatpush3.bf16.msra.mxu1 %v647_v21 }
 0x13c   : > { %882 = vmatprep.subr.bf16.mxu1 %v983_v14 }
 0x13f   : > { %883 = vmatpush3.bf16.msra.mxu1 %v646_v58 }
 0x142   : > { %885 = vmatmul.mubr.msk.bf16.vlgmr.msra.gmra.mxu1 %vm823_vm6, %v985_v55 }
 0x202   : > { %v688_v7 = vpop.f32.mrf.mxu1 }
 0x203   : > { %v694_v25 = vadd.f32 %v688_v7, %v644_v4 }
 0x204   : > { %v886_v14 = vpop.f32.mrf.mxu1  ;;  %708 = sbr.rel (%p825_p6) target bundleno = 671 (0x29f), region = 60 }
 0x205   : > { %696 = vst.msk [vmem:[#allocation2] sm:$0x7] %vm695_vm8, %v694_v25 }
 0x206   : > { %v691_v26 = vpop.f32.mrf.mxu1 }
 0x208   : > { %v887_v27 = vpop.f32.mrf.mxu1 }
 0x209   : > { %v826_v28 = vld [vmem:[%s1188_s3] ss:$0 sm:$0xff]  ;;  %v722_v31 = vld [vmem:[#allocation4] sm:$0x1]  ;;  %v723_v32 = vld [vmem:[#allocation5] sm:$0x1] }
 0x20a   : > { %v732_v33 = vmul.f32 %v723_v32, %v722_v31  ;;  %v724_v36 = vld [vmem:[#allocation6] sm:$0x1]  ;;  %v728_v38 = vsub.s32 0, %v1078_v16  ;;  %v710_v42 = vld [vmem:[#allocation3] sm:$0x7] }
 0x20c   : > { %v709_v17 = vld [vmem:[#allocation2] sm:$0x7]  ;;  %v733_v40 = vadd.f32 %v732_v33, %v724_v36  ;;  %v729_v45 = vrot.slane %v723_v32, %v728_v38 }
 0x20d   : > { %v718_v29 = vmul.f32 %v826_v28, %v709_v17 }
 0x20e   : > { %v738_v41 = vrot.slane %v733_v40, %v728_v38 }
 0x20f   : > { %v719_v30 = vsel %vm695_vm8, %v718_v29, 0.0 }
 0x210   : > { %720 = vadd.xlane.f32.xlu0 %v719_v30  ;;  %v740_v46 = vmul.f32 %v738_v41, %v710_v42 }
 0x299   : > { %v721_v47 = vpop.xlane.xlu0 %720 }
 0x29a   : > { %v731_v50 = vmul.f32 %v729_v45, %v721_v47 }
 0x29c   : > { %v741_v52 = vadd.f32 %v740_v46, %v731_v50 }
 0x29e   : > { %742 = vst.msk [vmem:[%s1191_s8] sm:$0x7] %vm703_vm7, %v741_v52 }
 0x29f PF: > { %s24_s11 = sadd.s32 1, %s980_s11  }
 0x2a0   : > { %p21_p7 = scmp.ge.s32.totalorder %s24_s11, 5  }
 0x2a2   :  { %23 = sbr.rel (!%p21_p7) target bundleno = 4 (0x4), region = 89 }

</bundles_post_ra>
